<compile_context>
chip_gen: v7x
topology: tpu7x:2x2x1
jax: 0.10.0
libtpu: 0.0.40
codegen_flags: <defaults>
</compile_context>

<pallas_src>
import jax
import jax.numpy as jnp
from jax.experimental import pallas as pl
from jax.experimental.pallas import tpu as pltpu


def _round_up(x, m):
    return (x + m - 1) // m * m


# ---------------------------------------------------------------------------
# Kernel
# ---------------------------------------------------------------------------
def _tree_lstm_kernel(x_ref, c_ref, w_ref, b_ref, out_ref):
    """Fused TreeLSTM cell.

    x_ref : (bm, K)      bf16  = [l_h | r_h | rel_emb]
    c_ref : (bm, 2*Hp)   f32   = [l_c | r_c], each zero-padded to Hp lanes
    w_ref : (K, 5*Hp)    bf16  = vstack([W_l.T, W_r.T, W_rel.T]), gate-padded
    b_ref : (1, 5*Hp)    f32   = b_l + b_r (+ b_rel), gate-padded
    out   : (bm, 2*Hp)   f32   = [h_t | c_t]  (padded lanes are exactly 0)
    """
    Hp = c_ref.shape[-1] // 2

    # Single MXU push, f32 accumulation.
    gates = jnp.dot(x_ref[...], w_ref[...],
                    preferred_element_type=jnp.float32) + b_ref[...]

    # All slices land on 128-lane tile boundaries (Hp is a multiple of 128).
    i_g = jax.nn.sigmoid(gates[:, 0 * Hp:1 * Hp])
    f_l = jax.nn.sigmoid(gates[:, 1 * Hp:2 * Hp])
    f_r = jax.nn.sigmoid(gates[:, 2 * Hp:3 * Hp])
    o_g = jax.nn.sigmoid(gates[:, 3 * Hp:4 * Hp])
    g_g = jnp.tanh(gates[:, 4 * Hp:5 * Hp])

    c_t = f_l * c_ref[:, :Hp] + f_r * c_ref[:, Hp:] + i_g * g_g
    h_t = o_g * jnp.tanh(c_t)

    # Two lane-tile-aligned, unmasked stores.
    out_ref[:, :Hp] = h_t
    out_ref[:, Hp:] = c_t


# ---------------------------------------------------------------------------
# One-time parameter preprocessing (hoisted out of the per-node forward)
# ---------------------------------------------------------------------------
def _pad_gate_cols(mat_t, H, Hp):
    """(in_f, 5*H) -> (in_f, 5*Hp): each of the 5 gate blocks zero-padded to Hp."""
    in_f = mat_t.shape[0]
    m = mat_t.reshape(in_f, 5, H)
    m = jnp.pad(m, ((0, 0), (0, 0), (0, Hp - H)))
    return m.reshape(in_f, 5 * Hp)


def prepare_tree_lstm_params(params, hidden_size, use_rel,
                             compute_dtype=jnp.bfloat16):
    """Fuse + transpose + gate-pad the weights once (call at init, not per node)."""
    H = hidden_size
    Hp = _round_up(H, 128)

    w = jnp.concatenate([params["W_l"].T, params["W_r"].T], axis=0)   # (2H, 5H)
    b = params["b_l"] + params["b_r"]
    rel_dim = 0
    if use_rel:
        w = jnp.concatenate([w, params["W_rel"].T], axis=0)
        b = b + params["b_rel"]
        rel_dim = params["W_rel"].shape[1]

    w = _pad_gate_cols(w, H, Hp).astype(compute_dtype)                # (K, 5*Hp)
    b = _pad_gate_cols(b.reshape(1, 5 * H), H, Hp).astype(jnp.float32)

    return {"W": w, "b": b, "H": H, "Hp": Hp, "rel_dim": rel_dim,
            "compute_dtype": compute_dtype}


# ---------------------------------------------------------------------------
# Forward
# ---------------------------------------------------------------------------
def tree_lstm_forward(lhs, rhs, rel_emb, prep, *, batch_block=512):
    """Matches TreeLstm.forward: returns cat([h_t, c_t], dim=1), shape (B, 2H)."""
    H, Hp = prep["H"], prep["Hp"]
    assert (rel_emb is None) == (prep["rel_dim"] == 0), \
        "prepared params must match rel_emb presence"

    B = lhs.shape[0]
    cdt = prep["compute_dtype"]

    l_h, l_c = lhs[:, :H], lhs[:, H:]
    r_h, r_c = rhs[:, :H], rhs[:, H:]

    parts = [l_h, r_h] if rel_emb is None else [l_h, r_h, rel_emb]
    x = jnp.concatenate(parts, axis=1).astype(cdt)                    # (B, K)
    K = x.shape[1]

    # Batch tiling: small B -> one block; large B -> 512-row blocks.
    # (bf16 x + f32 c + f32 out per 512-row block is a few MiB: plenty of
    #  headroom even on v7x's 64 MiB VMEM with double-buffering.)
    bm = min(batch_block, _round_up(B, 8))
    B_pad = _round_up(B, bm)
    if B_pad != B:
        x = jnp.pad(x, ((0, B_pad - B), (0, 0)))

    # Cell states stay f32 (elementwise math in f32, safe on v5e).
    c_cat = jnp.zeros((B_pad, 2 * Hp), jnp.float32)
    c_cat = c_cat.at[:B, :H].set(l_c.astype(jnp.float32))
    c_cat = c_cat.at[:B, Hp:Hp + H].set(r_c.astype(jnp.float32))

    out = pl.pallas_call(
        _tree_lstm_kernel,
        out_shape=jax.ShapeDtypeStruct((B_pad, 2 * Hp), jnp.float32),
        grid=(B_pad // bm,),
        in_specs=[
            pl.BlockSpec((bm, K), lambda i: (i, 0)),          # activations: tiled
            pl.BlockSpec((bm, 2 * Hp), lambda i: (i, 0)),     # cell states: tiled
            pl.BlockSpec((K, 5 * Hp), lambda i: (0, 0)),      # weights: resident
            pl.BlockSpec((1, 5 * Hp), lambda i: (0, 0)),      # bias: resident
        ],
        out_specs=pl.BlockSpec((bm, 2 * Hp), lambda i: (i, 0)),
        compiler_params=pltpu.CompilerParams(
            dimension_semantics=("parallel",)),
    )(x, c_cat, prep["W"], prep["b"])

    h_t = out[:B, :H]
    c_t = out[:B, Hp:Hp + H]
    return jnp.concatenate([h_t, c_t], axis=1).astype(lhs.dtype)


# ---------------------------------------------------------------------------
# Synthetic params + pure-JAX reference
# ---------------------------------------------------------------------------
def init_params(key, hidden_size, rel_hidden_size, dir_hidden_size,
                include_relation_embedding=True,
                include_direction_embedding=True):
    """Deterministic synthetic parameters with PyTorch nn.Linear shapes."""
    H = hidden_size
    keys = jax.random.split(key, 6)

    def lin(kw, kb, out_f, in_f):
        bound = 1.0 / jnp.sqrt(in_f)
        w = jax.random.uniform(kw, (out_f, in_f), jnp.float32, -bound, bound)
        b = jax.random.uniform(kb, (out_f,), jnp.float32, -bound, bound)
        return w, b

    params = {}
    params["W_l"], params["b_l"] = lin(keys[0], keys[1], 5 * H, H)
    params["W_r"], params["b_r"] = lin(keys[2], keys[3], 5 * H, H)

    if include_relation_embedding and include_direction_embedding:
        rel_in = rel_hidden_size + dir_hidden_size
    elif include_relation_embedding:
        rel_in = rel_hidden_size
    else:
        rel_in = None
    if rel_in is not None:
        params["W_rel"], params["b_rel"] = lin(keys[4], keys[5], 5 * H, rel_in)
    return params


def _reference(lhs, rhs, rel_emb, params, hidden_size,
               matmul_dtype=jnp.float32):
    """Mirrors the PyTorch forward; matmul_dtype controls operand precision."""
    H = hidden_size
    l_h, l_c = lhs[:, :H], lhs[:, H:]
    r_h, r_c = rhs[:, :H], rhs[:, H:]

    def lin(x, w, b):
        return jnp.dot(x.astype(matmul_dtype), w.T.astype(matmul_dtype),
                       preferred_element_type=jnp.float32) + b

    gates = lin(l_h, params["W_l"], params["b_l"]) \
          + lin(r_h, params["W_r"], params["b_r"])
    if rel_emb is not None:
        gates = gates + lin(rel_emb, params["W_rel"], params["b_rel"])

    i = jax.nn.sigmoid(gates[:, 0 * H:1 * H])
    f_l = jax.nn.sigmoid(gates[:, 1 * H:2 * H])
    f_r = jax.nn.sigmoid(gates[:, 2 * H:3 * H])
    o = jax.nn.sigmoid(gates[:, 3 * H:4 * H])
    g = jnp.tanh(gates[:, 4 * H:5 * H])
    c_t = f_l * l_c + f_r * r_c + i * g
    h_t = o * jnp.tanh(c_t)
    return jnp.concatenate([h_t, c_t], axis=1)


if __name__ == "__main__":
    hidden_size = 32
    rel_hidden_size = 16
    dir_hidden_size = 8
    batch = 8

    key = jax.random.PRNGKey(0)
    kp, kl, kr, ke = jax.random.split(key, 4)

    params = init_params(kp, hidden_size, rel_hidden_size, dir_hidden_size,
                         include_relation_embedding=True,
                         include_direction_embedding=True)

    lhs = jax.random.normal(kl, (batch, 2 * hidden_size), jnp.float32)
    rhs = jax.random.normal(kr, (batch, 2 * hidden_size), jnp.float32)
    rel_emb = jax.random.normal(
        ke, (batch, rel_hidden_size + dir_hidden_size), jnp.float32)

    # One-time preprocessing (would be cached alongside the module params).
    prep_rel = prepare_tree_lstm_params(params, hidden_size, use_rel=True)
    prep_norel = prepare_tree_lstm_params(params, hidden_size, use_rel=False)

    # --- with relation embedding ---
    out = jax.block_until_ready(
        tree_lstm_forward(lhs, rhs, rel_emb, prep_rel))
    assert out.shape == (batch, 2 * hidden_size)

    ref_bf16 = _reference(lhs, rhs, rel_emb, params, hidden_size, jnp.bfloat16)
    ref_f32 = _reference(lhs, rhs, rel_emb, params, hidden_size, jnp.float32)
    assert jnp.allclose(out, ref_bf16, atol=1e-3, rtol=1e-3), \
        "mismatch vs bf16-operand reference"
    assert jnp.allclose(out, ref_f32, atol=5e-2, rtol=5e-2), \
        "mismatch vs f32 reference (semantics)"

    # --- rel_emb=None branch (statically specialized: no zero matmul) ---
    out_none = jax.block_until_ready(
        tree_lstm_forward(lhs, rhs, None, prep_norel))
    ref_none_bf16 = _reference(lhs, rhs, None, params, hidden_size,
                               jnp.bfloat16)
    ref_none_f32 = _reference(lhs, rhs, None, params, hidden_size,
                              jnp.float32)
    assert jnp.allclose(out_none, ref_none_bf16, atol=1e-3, rtol=1e-3)
    assert jnp.allclose(out_none, ref_none_f32, atol=5e-2, rtol=5e-2)

    print("KERNEL_OK")
</pallas_src>

<mosaic_0001>
module attributes {stable_mosaic.version = 11 : i64} {
  func.func @_tree_lstm_kernel(%arg0: i32, %arg1: memref<8x88xbf16, #tpu.memory_space<vmem>>, %arg2: memref<8x256xf32, #tpu.memory_space<vmem>>, %arg3: memref<88x640xbf16, #tpu.memory_space<vmem>>, %arg4: memref<1x640xf32, #tpu.memory_space<vmem>>, %arg5: memref<8x256xf32, #tpu.memory_space<vmem>>) attributes {dimension_semantics = [#tpu.dimension_semantics<parallel>], iteration_bounds = array<i64: 1>, scalar_prefetch = 0 : i64, scratch_operands = 0 : i64, tpu.core_type = #tpu.core_type<tc>, window_params = [{transform_indices = @transform_0, window_bounds = array<i64: 8, 88>}, {transform_indices = @transform_1, window_bounds = array<i64: 8, 256>}, {pipeline_mode = #tpu.pipeline_mode<synchronous>, transform_indices = @transform_2, window_bounds = array<i64: 88, 640>}, {pipeline_mode = #tpu.pipeline_mode<synchronous>, transform_indices = @transform_3, window_bounds = array<i64: 1, 640>}, {transform_indices = @transform_4, window_bounds = array<i64: 8, 256>}]} {
    %c0 = arith.constant 0 : index
    %c0_0 = arith.constant 0 : index
    %0 = vector.load %arg1[%c0, %c0_0] : memref<8x88xbf16, #tpu.memory_space<vmem>>, vector<8x88xbf16>
    %c0_1 = arith.constant 0 : index
    %c0_2 = arith.constant 0 : index
    %1 = vector.load %arg3[%c0_1, %c0_2] : memref<88x640xbf16, #tpu.memory_space<vmem>>, vector<88x640xbf16>
    %cst = arith.constant dense<0.000000e+00> : vector<8x640xf32>
    %2 = tpu.matmul %0, %1, %cst {dimension_numbers = #tpu.dot_dimension_numbers<[1], [0], [0], [1], [0, 0, 1, 1], [], []>} : vector<8x88xbf16>, vector<88x640xbf16>, vector<8x640xf32> -> vector<8x640xf32>
    %c0_3 = arith.constant 0 : index
    %c0_4 = arith.constant 0 : index
    %3 = vector.load %arg4[%c0_3, %c0_4] : memref<1x640xf32, #tpu.memory_space<vmem>>, vector<1x640xf32>
    %4 = vector.broadcast %3 : vector<1x640xf32> to vector<8x640xf32>
    %5 = arith.addf %2, %4 : vector<8x640xf32>
    %6 = vector.extract_strided_slice %5 {offsets = [0, 0], sizes = [8, 128], strides = [1, 1]} : vector<8x640xf32> to vector<8x128xf32>
    %7 = arith.negf %6 : vector<8x128xf32>
    %8 = math.exp %7 : vector<8x128xf32>
    %cst_5 = arith.constant 1.000000e+00 : f32
    %9 = vector.broadcast %cst_5 : f32 to vector<8x128xf32>
    %10 = arith.addf %9, %8 : vector<8x128xf32>
    %11 = arith.divf %9, %10 : vector<8x128xf32>
    %12 = vector.extract_strided_slice %5 {offsets = [0, 128], sizes = [8, 128], strides = [1, 1]} : vector<8x640xf32> to vector<8x128xf32>
    %13 = arith.negf %12 : vector<8x128xf32>
    %14 = math.exp %13 : vector<8x128xf32>
    %cst_6 = arith.constant 1.000000e+00 : f32
    %15 = vector.broadcast %cst_6 : f32 to vector<8x128xf32>
    %16 = arith.addf %15, %14 : vector<8x128xf32>
    %17 = arith.divf %15, %16 : vector<8x128xf32>
    %18 = vector.extract_strided_slice %5 {offsets = [0, 256], sizes = [8, 128], strides = [1, 1]} : vector<8x640xf32> to vector<8x128xf32>
    %19 = arith.negf %18 : vector<8x128xf32>
    %20 = math.exp %19 : vector<8x128xf32>
    %cst_7 = arith.constant 1.000000e+00 : f32
    %21 = vector.broadcast %cst_7 : f32 to vector<8x128xf32>
    %22 = arith.addf %21, %20 : vector<8x128xf32>
    %23 = arith.divf %21, %22 : vector<8x128xf32>
    %24 = vector.extract_strided_slice %5 {offsets = [0, 384], sizes = [8, 128], strides = [1, 1]} : vector<8x640xf32> to vector<8x128xf32>
    %25 = arith.negf %24 : vector<8x128xf32>
    %26 = math.exp %25 : vector<8x128xf32>
    %cst_8 = arith.constant 1.000000e+00 : f32
    %27 = vector.broadcast %cst_8 : f32 to vector<8x128xf32>
    %28 = arith.addf %27, %26 : vector<8x128xf32>
    %29 = arith.divf %27, %28 : vector<8x128xf32>
    %30 = vector.extract_strided_slice %5 {offsets = [0, 512], sizes = [8, 128], strides = [1, 1]} : vector<8x640xf32> to vector<8x128xf32>
    %31 = math.tanh %30 : vector<8x128xf32>
    %c0_9 = arith.constant 0 : index
    %c0_10 = arith.constant 0 : index
    %32 = vector.load %arg2[%c0_9, %c0_10] : memref<8x256xf32, #tpu.memory_space<vmem>>, vector<8x128xf32>
    %33 = arith.mulf %17, %32 : vector<8x128xf32>
    %c0_11 = arith.constant 0 : index
    %c128 = arith.constant 128 : index
    %34 = vector.load %arg2[%c0_11, %c128] : memref<8x256xf32, #tpu.memory_space<vmem>>, vector<8x128xf32>
    %35 = arith.mulf %23, %34 : vector<8x128xf32>
    %36 = arith.addf %33, %35 : vector<8x128xf32>
    %37 = arith.mulf %11, %31 : vector<8x128xf32>
    %38 = arith.addf %36, %37 : vector<8x128xf32>
    %39 = math.tanh %38 : vector<8x128xf32>
    %40 = arith.mulf %29, %39 : vector<8x128xf32>
    %c0_12 = arith.constant 0 : index
    %c0_13 = arith.constant 0 : index
    %41 = vector.load %arg5[%c0_12, %c0_13] : memref<8x256xf32, #tpu.memory_space<vmem>>, vector<8x128xf32>
    tpu.vector_store %arg5[%c0_12, %c0_13], %40 {strides = array<i32>} : memref<8x256xf32, #tpu.memory_space<vmem>>, vector<8x128xf32>,
    %c0_14 = arith.constant 0 : index
    %c128_15 = arith.constant 128 : index
    %42 = vector.load %arg5[%c0_14, %c128_15] : memref<8x256xf32, #tpu.memory_space<vmem>>, vector<8x128xf32>
    tpu.vector_store %arg5[%c0_14, %c128_15], %38 {strides = array<i32>} : memref<8x256xf32, #tpu.memory_space<vmem>>, vector<8x128xf32>,
    return
  }
  func.func @transform_0(%arg0: i32) -> (i32, i32) {
    %c0_i32 = arith.constant 0 : i32
    %c0_i32_0 = arith.constant 0 : i32
    return %arg0, %c0_i32 : i32, i32
  }
  func.func @transform_1(%arg0: i32) -> (i32, i32) {
    %c0_i32 = arith.constant 0 : i32
    %c0_i32_0 = arith.constant 0 : i32
    return %arg0, %c0_i32 : i32, i32
  }
  func.func @transform_2(%arg0: i32) -> (i32, i32) {
    %c0_i32 = arith.constant 0 : i32
    %c0_i32_0 = arith.constant 0 : i32
    %c0_i32_1 = arith.constant 0 : i32
    return %c0_i32, %c0_i32_0 : i32, i32
  }
  func.func @transform_3(%arg0: i32) -> (i32, i32) {
    %c0_i32 = arith.constant 0 : i32
    %c0_i32_0 = arith.constant 0 : i32
    %c0_i32_1 = arith.constant 0 : i32
    return %c0_i32, %c0_i32_0 : i32, i32
  }
  func.func @transform_4(%arg0: i32) -> (i32, i32) {
    %c0_i32 = arith.constant 0 : i32
    %c0_i32_0 = arith.constant 0 : i32
    return %arg0, %c0_i32 : i32, i32
  }
}

</mosaic_0001>

<bundles_post_ra>
// kernel: tpu_custom_call.1
= control target key start
LH: loop header
LB: loop body
LE: loop exit
PB: predicated region body
PF: predicated region fallthrough
CT: control target
= control target key end

     0   :  { %9 = vsyncpa [#allocation3], 0  ;;  %s772_s0 = inlined_call_operand.hbm [shape: bf16[8,88], index: 0, kind: input, shape index: {}]   ;;  %s773_s1 = inlined_call_operand.hbm [shape: f32[8,256], index: 1, kind: input, shape index: {}]   ;;  %s774_s2 = inlined_call_operand.hbm [shape: bf16[88,640], index: 2, kind: input, shape index: {}]   ;;  %s775_s3 = inlined_call_operand.vmem [shape: f32[1,640], index: 3, kind: input, shape index: {}]   ;;  %s776_s4 = inlined_call_operand.hbm [shape: f32[8,256], index: 4, kind: output, shape index: {}]  }
   0x1   :  { %10 = vsyncpa [#allocation6], 0 }
   0x2   :  { %11 = vsyncpa [#allocation4], 0  ;;  %s679_s15 = smov [#allocation5]   ;;  %s680_s17 = smov [#allocation2]  }
   0x3   :  { %s28_s16 = sshll.u32 %s679_s15, 4  ;;  %s18_s18 = sshll.u32 %s680_s17, 4  ;;  %s29_s16 = int_to_ptr.vmem [resolvable:$true] %s28_s16  ;;  %s19_s18 = int_to_ptr.vmem [resolvable:$true] %s18_s18 }
   0x4   :  { %s585_s21 = scalar_lea.hbm %s773_s1, 256 }
   0x5   :  { %p586_p0 = scmp.ne.s32.totalorder %s773_s1, %s585_s21  ;;  %p589_p1 = scmp.lt.u32.totalorder %s585_s21, %s773_s1 }
   0x7   :  { %p591_p2 = pnand %p589_p1, %p586_p0 }
   0x9   :  { %594 = shalt.err (!%p591_p2)
}
   0xa   :  { %s595_s26 = scalar_lea.vmem %s29_s16, 256  ;;  %p600_p4 = scmp.lt.s32.totalorder %s29_s16, %s29_s16 }
   0xb   :  { %p596_p3 = scmp.ne.s32.totalorder %s29_s16, %s595_s26  ;;  %p601_p5 = scmp.lt.s32.totalorder %s595_s26, %s595_s26 }
   0xd   :  { %p602_p6 = por %p601_p5, %p600_p4 }
   0xf   :  { %p603_p7 = pnand %p602_p6, %p596_p3 }
  0x11   :  { %606 = shalt.err (!%p603_p7)
}
  0x12   :  { %31 = dma.hbm_to_vmem [thread:$0]  %s773_s1, 256, %s29_s16, [#allocation6]  }
  0x13   :  { %s607_s5 = scalar_lea.hbm %s772_s0, 64 }
  0x14   :  { %p608_p8 = scmp.ne.s32.totalorder %s772_s0, %s607_s5  ;;  %p611_p9 = scmp.lt.u32.totalorder %s607_s5, %s772_s0 }
  0x16   :  { %p613_p10 = pnand %p611_p9, %p608_p8 }
  0x18   :  { %616 = shalt.err (!%p613_p10)
}
  0x19   :  { %s617_s10 = scalar_lea.vmem %s19_s18, 64  ;;  %p622_p12 = scmp.lt.s32.totalorder %s19_s18, %s19_s18 }
  0x1a   :  { %p618_p11 = scmp.ne.s32.totalorder %s19_s18, %s617_s10  ;;  %p623_p13 = scmp.lt.s32.totalorder %s617_s10, %s617_s10 }
  0x1c   :  { %p624_p0 = por %p623_p13, %p622_p12 }
  0x1e   :  { %p625_p1 = pnand %p624_p0, %p618_p11 }
  0x20   :  { %628 = shalt.err (!%p625_p1)
}
  0x21   :  { %21 = dma.hbm_to_vmem [thread:$0]  %s772_s0, 64, %s19_s18, [#allocation3]  }
  0x22   :  { %s681_s12 = smov [#allocation7]   ;;  %s629_s16 = scalar_lea.hbm %s774_s2, 3520 }
  0x23   :  { %s37_s13 = sshll.u32 %s681_s12, 4  ;;  %p630_p2 = scmp.ne.s32.totalorder %s774_s2, %s629_s16  ;;  %s38_s13 = int_to_ptr.vmem [resolvable:$true] %s37_s13 }
  0x24   :  { %p633_p3 = scmp.lt.u32.totalorder %s629_s16, %s774_s2 }
  0x26   :  { %p635_p4 = pnand %p633_p3, %p630_p2 }
  0x28   :  { %638 = shalt.err (!%p635_p4)
}
  0x29   :  { %s639_s22 = scalar_lea.vmem %s38_s13, 3520  ;;  %p644_p6 = scmp.lt.s32.totalorder %s38_s13, %s38_s13 }
  0x2a   :  { %p640_p5 = scmp.ne.s32.totalorder %s38_s13, %s639_s22  ;;  %p645_p7 = scmp.lt.s32.totalorder %s639_s22, %s639_s22 }
  0x2c   :  { %p646_p8 = por %p645_p7, %p644_p6 }
  0x2e   :  { %p647_p9 = pnand %p646_p8, %p640_p5 }
  0x30   :  { %650 = shalt.err (!%p647_p9)
}
  0x31   :  { %s682_s0 = smov 320   ;;  %s683_s18 = smov 20  }
  0x32   :  { %43 = dma.hbm_to_vmem [thread:$0]  %s774_s2, 3520, %s38_s13, [#allocation6], %s682_s0, %s682_s0, %s683_s18  }
  0x33   :  { %673 = dma.done.wait [#allocation3], 64  }
  0x34   :  { %674 = vsyncadd [#allocation3], 4294967232 }
  0x35   :  { %675 = dma.done.wait [#allocation6], 3776  }
  0x36   :  { %676 = vsyncadd [#allocation6], 4294963520  ;;  %v684_v0 = vmov 0   ;;  %v525_v1 = vld [vmem:[#allocation7 + $0x4] ss:$20 sps:$4 sm:$0xff]   ;;  %v87_v19 = vld [vmem:[#allocation7 + $0xc8] sm:$0xff]  ;;  %v92_v38 = vlaneseq }
  0x37   :  { %312 = vmatprep.mubr.bf16.mxu0 %v684_v0  ;;  %353 = vmatprep.mubr.bf16.mxu1 %v684_v0  ;;  %v527_v2 = vld [vmem:[#allocation7] ss:$20 sps:$4 sm:$0xff]   ;;  %v530_v4 = vld [vmem:[#allocation7 + $0x8] ss:$20 sps:$4 sm:$0xff]   ;;  %v536_v8 = vld [vmem:[#allocation7 + $0x30] ss:$20 sps:$4 sm:$0xff]   ;;  %v480_v22 = vcombine.high %v87_v19, %v87_v19  ;;  %v479_v23 = vcombine.low %v87_v19, %v87_v19 }
  0x38   :  { %280 = vmatprep.subr.bf16.mxu0 %v525_v1  ;;  %v528_v3 = vld [vmem:[#allocation7 + $0xc] ss:$20 sps:$4 sm:$0xff]   ;;  %v533_v6 = vld [vmem:[#allocation7 + $0x28] ss:$20 sps:$4 sm:$0xff]   ;;  %v539_v10 = vld [vmem:[#allocation7 + $0x50] ss:$20 sps:$4 sm:$0xff]  }
  0x39   :  { %281 = vmatpush1.bf16.msra.mxu0 %v527_v2  ;;  %v531_v5 = vld [vmem:[#allocation7 + $0x2c] ss:$20 sps:$4 sm:$0xff]   ;;  %321 = vmatprep.subr.bf16.mxu1 %v528_v3  ;;  %v534_v7 = vld [vmem:[#allocation7 + $0x34] ss:$20 sps:$4 sm:$0xff]   ;;  %v540_v11 = vld [vmem:[#allocation7 + $0x5c] ss:$20 sps:$4 sm:$0xff]  }
  0x3a   :  { %322 = vmatpush1.bf16.msra.mxu1 %v530_v4  ;;  %282 = vmatprep.subr.bf16.mxu0 %v531_v5  ;;  %v537_v9 = vld [vmem:[#allocation7 + $0x54] ss:$20 sps:$4 sm:$0xff]   ;;  %v543_v12 = vld [vmem:[#allocation7 + $0x7c] ss:$20 sps:$4 sm:$0xff]   ;;  %v542_v13 = vld [vmem:[#allocation7 + $0x58] ss:$20 sps:$4 sm:$0xff]  }
  0x3b   :  { %323 = vmatprep.subr.bf16.mxu1 %v534_v7  ;;  %v546_v14 = vld [vmem:[#allocation7 + $0x84] ss:$20 sps:$4 sm:$0xff]   ;;  %v548_v17 = vld [vmem:[#allocation7 + $0x80] ss:$20 sps:$4 sm:$0xff]   ;;  %vm264_vm0 = vcmask 1043456   ;;  %vm260_vm1 = vcmask 719872  }
  0x3c   :  { %v545_v15 = vld [vmem:[#allocation7 + $0x78] ss:$20 sps:$4 sm:$0xff]   ;;  %v551_v18 = vld [vmem:[#allocation7 + $0xa0] ss:$20 sps:$4 sm:$0xff]   ;;  %v554_v24 = vld [vmem:[#allocation7 + $0xa8] ss:$20 sps:$4 sm:$0xff]  }
  0x3d   :  { %283 = vmatpush1.bf16.msra.mxu0 %v533_v6  ;;  %v549_v16 = vld [vmem:[#allocation7 + $0xa4] ss:$20 sps:$4 sm:$0xff]   ;;  %v552_v20 = vld [vmem:[#allocation7 + $0xac] ss:$20 sps:$4 sm:$0xff]   ;;  %v88_v21 = vld [vmem:[#allocation7 + $0xd0] sm:$0xff]  ;;  %v266_v27 = vsel %vm264_vm0, %v479_v23, 0 }
  0x3e   :  { %284 = vmatprep.subr.bf16.mxu0 %v537_v9  ;;  %324 = vmatpush1.bf16.msra.mxu1 %v536_v8  ;;  %v482_v25 = vcombine.high %v88_v21, %v88_v21  ;;  %v481_v26 = vcombine.low %v88_v21, %v88_v21  ;;  %v56_v29 = vld [vmem:[#allocation2] sm:$0xf]  ;;  %v559_v30 = vld [vmem:[#allocation7 + $0x10] ss:$20 sps:$4 sm:$0xff]   ;;  %v685_v31 = vmov 0.0   ;;  %vm686_vm2 = vmmov 0  }
  0x3f   :  { %325 = vmatprep.subr.bf16.mxu1 %v540_v11  ;;  %v560_v32 = vld [vmem:[#allocation7 + $0x38] ss:$20 sps:$4 sm:$0xff]   ;;  %v561_v33 = vld [vmem:[#allocation7 + $0x60] ss:$20 sps:$4 sm:$0xff]   ;;  %v562_v34 = vld [vmem:[#allocation7 + $0x88] ss:$20 sps:$4 sm:$0xff]  }
  0x40   :  { %v272_v28 = vsel %vm264_vm0, %v481_v26, 0  ;;  %v563_v35 = vld [vmem:[#allocation7 + $0xb0] ss:$20 sps:$4 sm:$0xff]   ;;  %v564_v36 = vld [vmem:[#allocation7 + $0xd8] ss:$0 sps:$4 sm:$0xff]   ;;  %v93_v39 = vshrl.u32 %v92_v38, 7 }
  0x41   :  { %285 = vmatpush1.bf16.msra.mxu0 %v539_v10  ;;  %v278_v37 = vsel %vm264_vm0, %v564_v36, 0  ;;  %v90_v41 = vld [vmem:[%s775_s3] sm:$0x1f]  ;;  %s687_s3 = smov [#allocation8]  }
  0x42   :  { %286 = vmatprep.subr.bf16.mxu0 %v543_v12  ;;  %326 = vmatpush1.bf16.msra.mxu1 %v542_v13  ;;  %v94_v40 = vsub.s32 0, %v93_v39  ;;  %v98_v42 = vsub.s32 1, %v93_v39  ;;  %v102_v43 = vsub.s32 2, %v93_v39  ;;  %v106_v61 = vsub.s32 3, %v93_v39  ;;  %s444_s26 = sshll.u32 %s687_s3, 4  ;;  %s445_s26 = int_to_ptr.vmem [resolvable:$true] %s444_s26 }
  0x43   :  { %327 = vmatprep.subr.bf16.mxu1 %v546_v14  ;;  %v110_v3 = vsub.s32 4, %v93_v39  ;;  %v427_v14 = vld [vmem:[#allocation5] sm:$0xff]  ;;  %s651_s27 = scalar_lea.vmem %s445_s26, 256  ;;  %p656_p11 = scmp.lt.s32.totalorder %s445_s26, %s445_s26 }
  0x44   :  { %v95_v44 = vrot.slane %v90_v41, %v94_v40  ;;  %v99_v45 = vrot.slane %v90_v41, %v98_v42  ;;  %v103_v46 = vrot.slane %v90_v41, %v102_v43  ;;  %v107_v62 = vrot.slane %v90_v41, %v106_v61  ;;  %p652_p10 = scmp.ne.s32.totalorder %s445_s26, %s651_s27  ;;  %p657_p12 = scmp.lt.s32.totalorder %s651_s27, %s651_s27 }
  0x45   :  { %287 = vmatpush1.bf16.msra.mxu0 %v545_v15  ;;  %v111_v7 = vrot.slane %v90_v41, %v110_v3  ;;  %v429_v15 = vld [vmem:[#allocation5 + $0x8] sm:$0xff] }
  0x46   :  { %288 = vmatprep.subr.bf16.mxu0 %v549_v16  ;;  %328 = vmatpush1.bf16.msra.mxu1 %v548_v17  ;;  %p658_p13 = por %p657_p12, %p656_p11 }
  0x47   :  { %329 = vmatprep.subr.bf16.mxu1 %v552_v20 }
  0x48   :  { %p659_p0 = pnand %p658_p13, %p652_p10 }
  0x49   :  { %289 = vmatpush1.bf16.msra.mxu0 %v551_v18 }
  0x4a   :  { %484 = vmatprep.subr.msk.bf16.mxu0 %vm264_vm0, %v480_v22  ;;  %330 = vmatpush1.bf16.msra.mxu1 %v554_v24 }
  0x4b   :  { %486 = vmatprep.subr.msk.bf16.mxu1 %vm264_vm0, %v482_v25 }
  0x4d   :  { %291 = vmatpush1.bf16.msra.mxu0 %v266_v27 }
  0x4e   :  { %500 = vmatprep.subr.bf16.mxu0 %v685_v31  ;;  %332 = vmatpush1.bf16.msra.mxu1 %v272_v28 }
  0x50   :  { %485 = vmatmul.mubr.msk.bf16.vlgmr.msra.gmra.mrb[0].mxu0 %vm260_vm1, %v56_v29 }
  0x51   :  { %501 = vmatpush3.bf16.msra.mxu0 %v559_v30  ;;  %512 = vmatprep.mubr.msk.bf16.mxu0 %vm686_vm2, %v685_v31 }
  0x52   :  { %487 = vmatmul.mubr.msk.bf16.vlgmr.msra.gmra.mrb[0].mxu1 %vm260_vm1, %v56_v29  ;;  %502 = vmatprep.subr.bf16.mxu0 %v685_v31 }
  0x55   :  { %503 = vmatpush3.bf16.msra.mxu0 %v560_v32 }
  0x56   :  { %504 = vmatprep.subr.bf16.mxu0 %v685_v31 }
  0x59   :  { %505 = vmatpush3.bf16.msra.mxu0 %v561_v33 }
  0x5a   :  { %506 = vmatprep.subr.bf16.mxu0 %v685_v31 }
  0x5d   :  { %507 = vmatpush3.bf16.msra.mxu0 %v562_v34 }
  0x5e   :  { %508 = vmatprep.subr.bf16.mxu0 %v685_v31 }
  0x61   :  { %509 = vmatpush3.bf16.msra.mxu0 %v563_v35 }
  0x62   :  { %510 = vmatprep.subr.bf16.mxu0 %v685_v31 }
  0x65   :  { %511 = vmatpush3.bf16.msra.mxu0 %v278_v37 }
  0x68   :  { %513 = vmatmul.mubr.msk.bf16.vlgmr.msra.gmra.mrb[4].mxu0 %vm260_vm1, %v56_v29 }
 0x123   :  { %v314_v47 = vpop.f32.mrb[0].mxu0 }
 0x124   :  { %v315_v48 = vadd.f32 %v314_v47, %v95_v44  ;;  %v316_v49 = vpop.f32.mrb[1].mxu0 }
 0x125   :  { %v317_v50 = vadd.f32 %v316_v49, %v99_v45  ;;  %v355_v51 = vpop.f32.mrb[0].mxu1  ;;  %v318_v52 = vpop.f32.mrb[2].mxu0 }
 0x126   :  { %v356_v53 = vadd.f32 %v355_v51, %v103_v46  ;;  %v319_v54 = vpop.f32.mrb[3].mxu0  ;;  %v357_v55 = vpop.f32.mrb[1].mxu1  ;;  %v489_v58 = vmul.f32 -1.442695, %v315_v48 }
 0x127   :  { %v490_v56 = vmul.f32 -1.442695, %v317_v50  ;;  %v359_v57 = vpop.f32.mrb[2].mxu1  ;;  %v358_v0 = vadd.f32 %v357_v55, %v107_v62 }
 0x128   :  { %v491_v59 = vmul.f32 -1.442695, %v356_v53  ;;  %v360_v60 = vpop.f32.mrb[3].mxu1 }
 0x129   :  { %565 = vpow2.f32 %v490_v56  ;;  %v492_v6 = vmul.f32 -1.442695, %v358_v0 }
 0x12a   :  { %567 = vpow2.f32 %v491_v59 }
 0x12b   :  { %569 = vpow2.f32 %v489_v58 }
 0x133   :  { %v566_v63 = vpop.eup %565 }
 0x134   :  { %v568_v1 = vpop.eup %567  ;;  %v411_v2 = vadd.f32 1.0, %v566_v63 }
 0x135   :  { %v417_v4 = vadd.f32 1.0, %v568_v1  ;;  %v570_v5 = vpop.eup %569 }
 0x136   :  { %571 = vrcp.f32 %v411_v2  ;;  %v405_v8 = vadd.f32 1.0, %v570_v5 }
 0x137   :  { %573 = vrcp.f32 %v417_v4 }
 0x138   :  { %575 = vpow2.f32 %v492_v6 }
 0x139   :  { %577 = vrcp.f32 %v405_v8 }
 0x13b   :  { %v396_v9 = vpop.f32.mrb[4].mxu0 }
 0x13c   :  { %v397_v10 = vadd.f32 %v396_v9, %v111_v7  ;;  %v514_v11 = vpop.f32.mrb[5].mxu0 }
 0x13d   :  { %v399_v12 = vpop.f32.mrb[6].mxu0 }
 0x13e   :  { %579 = vtanh.f32 %v397_v10  ;;  %v515_v13 = vpop.f32.mrb[7].mxu0 }
 0x140   :  { %v572_v16 = vpop.eup %571 }
 0x141   :  { %v574_v17 = vpop.eup %573  ;;  %v428_v18 = vmul.f32 %v572_v16, %v427_v14 }
 0x142   :  { %v430_v19 = vmul.f32 %v574_v17, %v429_v15  ;;  %v576_v21 = vpop.eup %575 }
 0x143   :  { %v578_v22 = vpop.eup %577  ;;  %v423_v24 = vadd.f32 1.0, %v576_v21 }
 0x144   :  { %v431_v20 = vadd.f32 %v430_v19, %v428_v18 }
 0x145   :  { %581 = vrcp.f32 %v423_v24 }
 0x148   :  { %v580_v23 = vpop.eup %579 }
 0x149   :  { %v432_v25 = vmul.f32 %v580_v23, %v578_v22 }
 0x14b   :  { %v433_v26 = vadd.f32 %v432_v25, %v431_v20 }
 0x14d   :  { %583 = vtanh.f32 %v433_v26  ;;  %437 = vst [vmem:[#allocation8 + $0x8] sm:$0xff] %v433_v26 }
 0x14f   :  { %v582_v27 = vpop.eup %581 }
 0x157   :  { %v584_v28 = vpop.eup %583 }
 0x158   :  { %v435_v29 = vmul.f32 %v584_v28, %v582_v27 }
 0x15a   :  { %436 = vst [vmem:[#allocation8] sm:$0xff] %v435_v29 }
 0x15b   :  { %662 = shalt.err (!%p659_p0)
}
 0x15c   :  { %s663_s30 = scalar_lea.hbm %s776_s4, 256 }
 0x15d   :  { %p664_p1 = scmp.ne.s32.totalorder %s776_s4, %s663_s30  ;;  %p667_p2 = scmp.lt.u32.totalorder %s663_s30, %s776_s4 }
 0x15f   :  { %p669_p3 = pnand %p667_p2, %p664_p1 }
 0x161   :  { %672 = shalt.err (!%p669_p3)
}
 0x162   :  { %447 = dma.vmem_to_hbm [thread:$0]  %s445_s26, 256, %s776_s4, [#allocation4]  }
 0x163   :  { %677 = dma.done.wait [#allocation4], 256  }
 0x164   :  { %678 = vsyncadd [#allocation4], 4294967040 }
 0x165   :  { %451 = vsyncpa [#allocation3], 1 }
 0x166   :  { %452 = vsyncpa [#allocation6], 1 }
 0x167   :  { %453 = vsyncpa [#allocation4], 1 }

</bundles_post_ra>
